<compile_context>
chip_gen: v7x
topology: tpu7x:2x2x1
jax: 0.10.0
libtpu: 0.0.40
codegen_flags: <defaults>
</compile_context>

<pallas_src>
import functools

import jax
import jax.numpy as jnp
from jax import lax
from jax.experimental import pallas as pl
from jax.experimental.pallas import tpu as pltpu


_LANE = 128
_SUBLANE = 8
_CHUNK_ROWS = 256            # rows per in-kernel accumulation chunk (<=32 vregs)
_MIN_REPEAT_ROWS = 256       # min weight rows to stream a repeated weight block

_ARBITRARY = getattr(pltpu, "ARBITRARY", "arbitrary")
_CORE_PARALLEL = getattr(pltpu, "CORE_PARALLEL",
                         getattr(pltpu, "PARALLEL", "parallel"))
_CompilerParams = getattr(pltpu, "CompilerParams", None) or getattr(
    pltpu, "TPUCompilerParams")


def _cdiv(a, b):
    return -(-a // b)


@functools.lru_cache(maxsize=1)
def _generation_params():
    """(core_splits, default max tile rows, vmem_limit_bytes) per generation."""
    try:
        kind = jax.devices()[0].device_kind.lower()
    except Exception:  # pragma: no cover - defensive
        kind = ""
    if "v7" in kind:
        # 2 TensorCores share HBM: shard the stream across them; bigger tiles
        # keep the ~0.35us/step overhead well under 15% of a ~1us step.
        return 2, 8192, 48 * 1024 * 1024
    if "v6" in kind:
        return 1, 4096, 32 * 1024 * 1024
    # v5e / unknown: single TensorCore; 2048-row tiles are already 2-4us/step.
    return 1, 2048, 32 * 1024 * 1024


def _is_row_repeat_broadcast(pred_shape, w_shape):
    """True iff broadcasting w to pred only repeats w along leading dims.

    In that case pred flat index e maps to weight flat index e % w.size, i.e.
    the flattened (rows, 128) view of the weight simply repeats row-wise.
    """
    k = len(w_shape)
    if k > len(pred_shape):
        return False
    ps = pred_shape[len(pred_shape) - k:]
    j = k
    while j > 0 and w_shape[j - 1] == ps[j - 1]:
        j -= 1
    return all(d == 1 for d in w_shape[:j])


def _pick_chunk(tile_rows, granule):
    """Largest chunk <= _CHUNK_ROWS (multiple of granule) dividing tile_rows."""
    c = min(_CHUNK_ROWS, tile_rows)
    c = max(granule, (c // granule) * granule)
    while tile_rows % c:
        c -= granule
    return c


def _make_kernel(*, rows, tile_rows, chunk_rows, num_blocks, inner, two_axis,
                 has_weight, with_wsum, w_resident, w_block_rows):
    """Kernel closure with all static shape/mode info baked in."""
    n_chunks = tile_rows // chunk_rows
    groups = chunk_rows // _SUBLANE
    ragged = (rows % tile_rows) != 0
    total_blocks = (2 * inner) if two_axis else num_blocks
    has_phantom = total_blocks > num_blocks
    unroll = n_chunks <= 8

    def kernel(*refs):
        pos = 0
        p_ref = refs[pos]; pos += 1
        t_ref = refs[pos]; pos += 1
        w_ref = None
        if has_weight:
            w_ref = refs[pos]; pos += 1
        loss_out = refs[pos]; pos += 1
        wsum_out = None
        if with_wsum:
            wsum_out = refs[pos]; pos += 1
        acc = refs[pos]; pos += 1
        wacc = refs[pos] if with_wsum else None

        if two_axis:
            c = pl.program_id(0)
            i = pl.program_id(1)
            n_inner = pl.num_programs(1)
            b = c * inner + i
        else:
            i = pl.program_id(0)
            n_inner = pl.num_programs(0)
            b = i

        @pl.when(i == 0)
        def _init():
            acc[...] = jnp.zeros_like(acc)
            if with_wsum:
                wacc[...] = jnp.zeros_like(wacc)

        # Resident (small, leading-dim broadcast) weight: loaded once per grid
        # step and tiled in-register to one chunk's worth of rows -- pure VPU
        # copies that hide under the HBM-bound stream, no HBM materialization.
        w_chunk_resident = None
        if has_weight and w_resident:
            w_chunk_resident = w_ref[...].astype(jnp.float32)
            reps = chunk_rows // w_block_rows
            if reps > 1:
                w_chunk_resident = jnp.tile(w_chunk_resident, (reps, 1))

        def accum(masked):
            def body(ci, carry):
                r0 = pl.multiple_of(ci * chunk_rows, chunk_rows)
                # Upcast AFTER the DMA so HBM traffic stays at input width.
                p = p_ref[pl.ds(r0, chunk_rows), :].astype(jnp.float32)
                t = t_ref[pl.ds(r0, chunk_rows), :].astype(jnp.float32)
                contrib = jnp.abs(p - t)
                w = None
                if has_weight:
                    if w_resident:
                        w = w_chunk_resident
                    else:
                        w = w_ref[pl.ds(r0, chunk_rows), :].astype(jnp.float32)
                    contrib = contrib * w
                if masked:
                    row = (b * tile_rows + r0
                           + lax.broadcasted_iota(jnp.int32,
                                                  (chunk_rows, _LANE), 0))
                    valid = row < rows
                    contrib = jnp.where(valid, contrib, 0.0)
                # vreg-aligned partial reduce (chunk,128) -> (8,128): VPU adds
                # only; the cross-sublane/lane reduce happens once outside.
                acc[...] += contrib.reshape(groups, _SUBLANE, _LANE).sum(axis=0)
                if with_wsum:
                    wv = w
                    if masked:
                        wv = jnp.where(valid, wv, 0.0)
                    wacc[...] += wv.reshape(groups, _SUBLANE, _LANE).sum(axis=0)
                return carry

            lax.fori_loop(0, n_chunks, body, 0, unroll=unroll)

        if not (ragged or has_phantom):
            accum(masked=False)
        else:
            # Interior blocks skip the iota/compare/select entirely; only the
            # boundary block pays the ragged-tail mask; phantom blocks
            # (clamped re-reads past num_blocks) skip all compute.
            @pl.when(b < num_blocks - 1)
            def _interior():
                accum(masked=False)

            @pl.when(b == num_blocks - 1)
            def _boundary():
                accum(masked=ragged)

        @pl.when(i == n_inner - 1)
        def _finalize():
            loss_out[...] = acc[...]
            if with_wsum:
                wsum_out[...] = wacc[...]

    return kernel


def _pallas_l1_sums(pred, target, weight, *, max_tile_rows=None,
                    force_splits=None):
    """Return (sum(|pred-target|*weight), sum(weight expand_as pred)) as f32."""
    pred = jnp.asarray(pred)
    target = jnp.asarray(target)
    weight = jnp.asarray(weight)
    n = pred.size
    if n == 0:
        return jnp.float32(0.0), jnp.float32(0.0)

    splits_gen, tile_gen, vmem_limit = _generation_params()
    if max_tile_rows is None:
        max_tile_rows = tile_gen
    if force_splits is not None:
        splits_gen = force_splits

    # Sublane granule for the narrowest involved dtype (8 f32, 16 bf16, 32 i8).
    granule = _SUBLANE
    for a in (pred, target, weight):
        granule = max(granule, 32 // max(jnp.dtype(a.dtype).itemsize, 1))

    rows = n // _LANE if n % _LANE == 0 else 0
    use_pallas = (n % _LANE == 0) and (rows >= granule)
    if not use_pallas:
        # Tiny / lane-misaligned tensors: a kernel launch costs more than the
        # math.  sum(expand_as(w)) == sum(w) * (pred.size / weight.size).
        p32 = pred.astype(jnp.float32)
        t32 = target.astype(jnp.float32)
        w32 = weight.astype(jnp.float32)
        loss = jnp.sum(jnp.abs(p32 - t32) * w32)
        wsum = jnp.sum(w32) * jnp.float32(n // weight.size)
        return loss, wsum

    if target.shape != pred.shape:
        # TODO(synk): stream broadcast targets via index_map like the weight;
        # mismatched targets are rare for this loss so we materialize for now.
        target = jnp.broadcast_to(target, pred.shape)

    # ---- choose tiling and the weight-handling mode -------------------------
    tile_rows = min(max_tile_rows, rows)
    tile_rows = max(granule, (tile_rows // granule) * granule)

    orig_weight = weight
    w_rows = 0
    if weight.size == 1:
        w_mode = "scalar"
    elif weight.size == n:
        w_mode = "full"
    else:
        w_rows = weight.size // _LANE if (weight.size % _LANE == 0) else 0
        repeat = (w_rows >= granule and w_rows % granule == 0
                  and _is_row_repeat_broadcast(pred.shape, weight.shape))
        if repeat and w_rows % tile_rows == 0:
            w_mode = "repeat_stream"        # >= one tile; modulo index_map
        elif repeat and tile_rows % w_rows == 0 and w_rows <= _CHUNK_ROWS:
            w_mode = "repeat_resident"      # whole weight resident in VMEM
        elif repeat and _MIN_REPEAT_ROWS <= w_rows <= max_tile_rows:
            tile_rows = w_rows              # shrink tile to one weight period
            w_mode = "repeat_stream"
        else:
            # TODO(synk): non-leading-dim expand_as broadcasts (e.g. middle or
            # trailing dims) still materialize a pred-sized weight in HBM.
            weight = jnp.broadcast_to(weight, pred.shape)
            w_mode = "full"

    has_weight = w_mode != "scalar"
    with_wsum = w_mode == "full"            # else wsum is analytic (cheap)
    w_resident = w_mode == "repeat_resident"

    chunk_rows = _pick_chunk(tile_rows, granule)
    if w_resident and chunk_rows % w_rows != 0:
        c = (min(_CHUNK_ROWS, tile_rows) // w_rows) * w_rows
        while c > w_rows and tile_rows % c:
            c -= w_rows
        chunk_rows = c

    num_blocks = _cdiv(rows, tile_rows)
    splits = splits_gen if (splits_gen > 1 and num_blocks >= 4) else 1
    two_axis = splits > 1
    inner = _cdiv(num_blocks, splits)

    # Free (bitcast) reshapes to lane-dense (rows, 128) views.
    p2 = pred.reshape(rows, _LANE)
    t2 = target.reshape(rows, _LANE)

    if two_axis:
        def pt_map(c, i):
            # Clamp phantom tail steps; their compute is skipped in-kernel.
            return (jnp.minimum(c * inner + i, num_blocks - 1), 0)
        out_map = lambda c, i: (c, 0)
    else:
        pt_map = lambda i: (i, 0)
        out_map = lambda i: (0, 0)

    tile_spec = pl.BlockSpec((tile_rows, _LANE), pt_map)
    in_arrays = [p2, t2]
    in_specs = [tile_spec, tile_spec]

    w_block_rows = 0
    if has_weight:
        if w_mode == "full":
            in_arrays.append(weight.reshape(rows, _LANE))
            in_specs.append(tile_spec)
            w_block_rows = tile_rows
        elif w_mode == "repeat_stream":
            wb = w_rows // tile_rows
            if two_axis:
                w_map = lambda c, i: ((c * inner + i) % wb, 0)
            else:
                w_map = lambda i: (i % wb, 0)
            in_arrays.append(weight.reshape(w_rows, _LANE))
            in_specs.append(pl.BlockSpec((tile_rows, _LANE), w_map))
            w_block_rows = tile_rows
        else:  # repeat_resident: whole weight stays in VMEM (block index 0).
            if two_axis:
                w_map = lambda c, i: (0, 0)
            else:
                w_map = lambda i: (0, 0)
            in_arrays.append(weight.reshape(w_rows, _LANE))
            in_specs.append(pl.BlockSpec((w_rows, _LANE), w_map))
            w_block_rows = w_rows

    acc_shape = jax.ShapeDtypeStruct((splits * _SUBLANE, _LANE), jnp.float32)
    acc_spec = pl.BlockSpec((_SUBLANE, _LANE), out_map)
    out_shapes = [acc_shape]
    out_specs = [acc_spec]
    scratch = [pltpu.VMEM((_SUBLANE, _LANE), jnp.float32)]
    if with_wsum:
        out_shapes.append(acc_shape)
        out_specs.append(acc_spec)
        scratch.append(pltpu.VMEM((_SUBLANE, _LANE), jnp.float32))

    if two_axis:
        grid = (splits, inner)
        dims = (_CORE_PARALLEL, _ARBITRARY)
    else:
        grid = (num_blocks,)
        dims = (_ARBITRARY,)

    kernel = _make_kernel(
        rows=rows, tile_rows=tile_rows, chunk_rows=chunk_rows,
        num_blocks=num_blocks, inner=inner, two_axis=two_axis,
        has_weight=has_weight, with_wsum=with_wsum,
        w_resident=w_resident, w_block_rows=w_block_rows)

    results = pl.pallas_call(
        kernel,
        out_shape=tuple(out_shapes),
        grid=grid,
        in_specs=in_specs,
        out_specs=tuple(out_specs),
        scratch_shapes=scratch,
        compiler_params=_CompilerParams(
            dimension_semantics=dims,
            vmem_limit_bytes=vmem_limit),
    )(*in_arrays)

    # Tiny final reductions (<= 2 * 8 * 128 elements) done in plain XLA.
    loss = jnp.sum(results[0])
    if w_mode == "scalar":
        w0 = orig_weight.reshape(()).astype(jnp.float32)
        loss = loss * w0
        wsum = w0 * jnp.float32(n)
    elif with_wsum:
        wsum = jnp.sum(results[1])
    else:
        # Analytic weight sum for broadcast weights:
        # sum(expand_as(w)) == sum(w) * (pred.size / weight.size).
        wsum = (jnp.sum(orig_weight.astype(jnp.float32))
                * jnp.float32(n // orig_weight.size))
    return loss, wsum


class MyL1Loss:
    """JAX/Pallas port of mmdet3d MyL1Loss (forward only)."""

    def __init__(self, reduction="mean", loss_weight=1.0):
        assert reduction in ("mean", "sum")
        self.reduction = reduction
        self.loss_weight = loss_weight

    def __call__(self, preds, targets, weights, avg_factor=None,
                 reduction_override=None):
        if not isinstance(preds, (list, tuple)):
            preds, targets, weights = [preds], [targets], [weights]

        # TODO(synk): fuse same-shaped list entries into one pallas_call to
        # amortize launch / pipeline warmup overhead for long head lists.
        loss_bboxes = jnp.float32(0.0)
        loss_num = jnp.float32(0.0)
        for pred, target, weight in zip(preds, targets, weights):
            s_loss, s_w = _pallas_l1_sums(pred, target, weight)
            loss_bboxes = loss_bboxes + s_loss
            loss_num = loss_num + s_w

        num = jnp.maximum(loss_num, jnp.float32(1.0))  # clamp_min(loss_num, 1)
        if self.reduction == "mean":
            loss_bboxes = loss_bboxes / num
            show = dict(error=loss_bboxes)
        else:
            show = dict(error=loss_bboxes / num)
        return loss_bboxes * self.loss_weight, show


def _reference(preds, targets, weights, reduction="mean", loss_weight=1.0):
    if not isinstance(preds, (list, tuple)):
        preds, targets, weights = [preds], [targets], [weights]
    loss_bboxes = jnp.float32(0.0)
    loss_num = jnp.float32(0.0)
    for p, t, w in zip(preds, targets, weights):
        p = p.astype(jnp.float32)
        t = t.astype(jnp.float32)
        w = w.astype(jnp.float32)
        loss_bboxes = loss_bboxes + jnp.sum(jnp.abs(p - t) * w)
        loss_num = loss_num + jnp.sum(jnp.broadcast_to(w, p.shape))
    num = jnp.maximum(loss_num, 1.0)
    if reduction == "mean":
        loss_bboxes = loss_bboxes / num
    return loss_bboxes * loss_weight


def _check_sums(pred, target, weight, max_tile_rows=None, rtol=1e-4, atol=1e-2):
    s_loss, s_w = _pallas_l1_sums(pred, target, weight,
                                  max_tile_rows=max_tile_rows)
    s_loss = jax.block_until_ready(s_loss)
    p32 = pred.astype(jnp.float32)
    t32 = target.astype(jnp.float32)
    w32 = weight.astype(jnp.float32)
    ref_loss = jnp.sum(jnp.abs(p32 - t32) * w32)
    ref_w = jnp.sum(jnp.broadcast_to(w32, p32.shape))
    assert jnp.allclose(s_loss, ref_loss, rtol=rtol, atol=atol), (s_loss, ref_loss)
    assert jnp.allclose(s_w, ref_w, rtol=rtol, atol=atol), (s_w, ref_w)


if __name__ == "__main__":
    key = jax.random.PRNGKey(0)
    keys = jax.random.split(key, 16)

    # 1) Module forward: expand_as weight on a middle dim (materialize
    #    fallback) plus a tiny lane-misaligned tensor (plain-JAX fallback).
    pred1 = jax.random.normal(keys[0], (2, 4, 16, 16), dtype=jnp.float32)
    targ1 = jax.random.normal(keys[1], (2, 4, 16, 16), dtype=jnp.float32)
    wght1 = jax.random.uniform(keys[2], (2, 1, 16, 16), dtype=jnp.float32)
    pred2 = jax.random.normal(keys[3], (2, 8, 7), dtype=jnp.float32)
    targ2 = jax.random.normal(keys[4], (2, 8, 7), dtype=jnp.float32)
    wght2 = jax.random.uniform(keys[5], (2, 8, 7), dtype=jnp.float32)

    loss_mod = MyL1Loss(reduction="mean", loss_weight=2.0)
    out, show = loss_mod([pred1, pred2], [targ1, targ2], [wght1, wght2])
    out = jax.block_until_ready(out)
    ref = _reference([pred1, pred2], [targ1, targ2], [wght1, wght2],
                     reduction="mean", loss_weight=2.0)
    assert jnp.allclose(out, ref, rtol=1e-4, atol=1e-5), (out, ref)
    assert jnp.allclose(show["error"], ref / 2.0, rtol=1e-4, atol=1e-5)

    # 2) Same-shape weight, multi-block ragged grid (boundary-only mask path).
    pred3 = jax.random.normal(keys[6], (20, 128), dtype=jnp.float32)
    targ3 = jax.random.normal(keys[7], (20, 128), dtype=jnp.float32)
    wght3 = jax.random.uniform(keys[8], (20, 128), dtype=jnp.float32)
    _check_sums(pred3, targ3, wght3, max_tile_rows=8)

    # 3) Leading-dim broadcast weight, small -> VMEM-resident, in-register tile.
    pred4 = jax.random.normal(keys[9], (32, 64, 128), dtype=jnp.float32)
    targ4 = jax.random.normal(keys[10], (32, 64, 128), dtype=jnp.float32)
    wght4 = jax.random.uniform(keys[11], (64, 128), dtype=jnp.float32)
    _check_sums(pred4, targ4, wght4)

    # 4) Leading-dim broadcast weight, large -> streamed via modulo index_map.
    pred5 = jax.random.normal(keys[12], (2, 4096, 128), dtype=jnp.float32)
    targ5 = jax.random.normal(keys[13], (2, 4096, 128), dtype=jnp.float32)
    wght5 = jax.random.uniform(keys[14], (4096, 128), dtype=jnp.float32)
    _check_sums(pred5, targ5, wght5, max_tile_rows=2048, rtol=2e-4)

    # 5) Scalar weight -> two-stream kernel (no weight DMA at all).
    wght6 = jnp.full((1, 1, 1), 0.5, dtype=jnp.float32)
    _check_sums(pred4, targ4, wght6)

    # 6) bf16 inputs (16-row sublane granule, dtype-preserving DMA).
    pred7 = jax.random.normal(keys[15], (4, 64, 128), dtype=jnp.bfloat16)
    targ7 = jax.random.normal(keys[0], (4, 64, 128), dtype=jnp.bfloat16)
    wght7 = jax.random.uniform(keys[1], (4, 64, 128), dtype=jnp.bfloat16)
    _check_sums(pred7, targ7, wght7, rtol=2e-3, atol=1e-2)

    print("KERNEL_OK")
</pallas_src>

<mosaic_0001>
module attributes {stable_mosaic.version = 11 : i64} {
  func.func @kernel(%arg0: i32, %arg1: memref<16x128xf32, #tpu.memory_space<vmem>>, %arg2: memref<16x128xf32, #tpu.memory_space<vmem>>, %arg3: memref<16x128xf32, #tpu.memory_space<vmem>>, %arg4: memref<8x128xf32, #tpu.memory_space<vmem>>, %arg5: memref<8x128xf32, #tpu.memory_space<vmem>>, %arg6: memref<8x128xf32, #tpu.memory_space<vmem>>, %arg7: memref<8x128xf32, #tpu.memory_space<vmem>>) attributes {dimension_semantics = [#tpu.dimension_semantics<arbitrary>], iteration_bounds = array<i64: 1>, scalar_prefetch = 0 : i64, scratch_operands = 2 : i64, tpu.core_type = #tpu.core_type<tc>, window_params = [{transform_indices = @transform_0, window_bounds = array<i64: 16, 128>}, {transform_indices = @transform_1, window_bounds = array<i64: 16, 128>}, {transform_indices = @transform_2, window_bounds = array<i64: 16, 128>}, {pipeline_mode = #tpu.pipeline_mode<synchronous>, transform_indices = @transform_3, window_bounds = array<i64: 8, 128>}, {pipeline_mode = #tpu.pipeline_mode<synchronous>, transform_indices = @transform_4, window_bounds = array<i64: 8, 128>}]} {
    %c0_i32 = arith.constant 0 : i32
    %0 = arith.cmpi eq, %arg0, %c0_i32 : i32
    %1 = arith.extui %0 : i1 to i32
    %c0_i32_0 = arith.constant 0 : i32
    %2 = arith.cmpi ne, %1, %c0_i32_0 : i32
    scf.if %2 {
      %cst_15 = arith.constant 0.000000e+00 : f32
      %27 = vector.broadcast %cst_15 : f32 to vector<8x128xf32>
      %c0_16 = arith.constant 0 : index
      %c0_17 = arith.constant 0 : index
      %28 = vector.load %arg6[%c0_16, %c0_17] : memref<8x128xf32, #tpu.memory_space<vmem>>, vector<8x128xf32>
      tpu.vector_store %arg6[%c0_16, %c0_17], %27 {strides = array<i32>} : memref<8x128xf32, #tpu.memory_space<vmem>>, vector<8x128xf32>,
      %cst_18 = arith.constant 0.000000e+00 : f32
      %29 = vector.broadcast %cst_18 : f32 to vector<8x128xf32>
      %c0_19 = arith.constant 0 : index
      %c0_20 = arith.constant 0 : index
      %30 = vector.load %arg7[%c0_19, %c0_20] : memref<8x128xf32, #tpu.memory_space<vmem>>, vector<8x128xf32>
      tpu.vector_store %arg7[%c0_19, %c0_20], %29 {strides = array<i32>} : memref<8x128xf32, #tpu.memory_space<vmem>>, vector<8x128xf32>,
    } else {
    }
    %c0_i32_1 = arith.constant 0 : i32
    %c16_i32 = arith.constant 16 : i32
    %3 = arith.muli %c0_i32_1, %c16_i32 : i32
    %4 = tpu.assume_multiple %3, 16 : i32
    %5 = arith.index_cast %4 : i32 to index
    %c0 = arith.constant 0 : index
    %6 = vector.load %arg1[%5, %c0] : memref<16x128xf32, #tpu.memory_space<vmem>>, vector<16x128xf32>
    %7 = arith.index_cast %4 : i32 to index
    %c0_2 = arith.constant 0 : index
    %8 = vector.load %arg2[%7, %c0_2] : memref<16x128xf32, #tpu.memory_space<vmem>>, vector<16x128xf32>
    %9 = arith.subf %6, %8 : vector<16x128xf32>
    %10 = math.absf %9 : vector<16x128xf32>
    %11 = arith.index_cast %4 : i32 to index
    %c0_3 = arith.constant 0 : index
    %12 = vector.load %arg3[%11, %c0_3] : memref<16x128xf32, #tpu.memory_space<vmem>>, vector<16x128xf32>
    %13 = arith.mulf %10, %12 : vector<16x128xf32>
    %c0_4 = arith.constant 0 : index
    %c0_5 = arith.constant 0 : index
    %14 = vector.load %arg6[%c0_4, %c0_5] : memref<8x128xf32, #tpu.memory_space<vmem>>, vector<8x128xf32>
    %15 = vector.shape_cast %13 : vector<16x128xf32> to vector<2x8x128xf32>
    %cst = arith.constant dense<0.000000e+00> : vector<8x128xf32>
    %16 = vector.multi_reduction <add>, %15, %cst [0] : vector<2x8x128xf32> to vector<8x128xf32>
    %17 = arith.addf %14, %16 : vector<8x128xf32>
    %c0_6 = arith.constant 0 : index
    %c0_7 = arith.constant 0 : index
    %18 = vector.load %arg6[%c0_6, %c0_7] : memref<8x128xf32, #tpu.memory_space<vmem>>, vector<8x128xf32>
    tpu.vector_store %arg6[%c0_6, %c0_7], %17 {strides = array<i32>} : memref<8x128xf32, #tpu.memory_space<vmem>>, vector<8x128xf32>,
    %c0_8 = arith.constant 0 : index
    %c0_9 = arith.constant 0 : index
    %19 = vector.load %arg7[%c0_8, %c0_9] : memref<8x128xf32, #tpu.memory_space<vmem>>, vector<8x128xf32>
    %20 = vector.shape_cast %12 : vector<16x128xf32> to vector<2x8x128xf32>
    %cst_10 = arith.constant dense<0.000000e+00> : vector<8x128xf32>
    %21 = vector.multi_reduction <add>, %20, %cst_10 [0] : vector<2x8x128xf32> to vector<8x128xf32>
    %22 = arith.addf %19, %21 : vector<8x128xf32>
    %c0_11 = arith.constant 0 : index
    %c0_12 = arith.constant 0 : index
    %23 = vector.load %arg7[%c0_11, %c0_12] : memref<8x128xf32, #tpu.memory_space<vmem>>, vector<8x128xf32>
    tpu.vector_store %arg7[%c0_11, %c0_12], %22 {strides = array<i32>} : memref<8x128xf32, #tpu.memory_space<vmem>>, vector<8x128xf32>,
    %c1_i32 = arith.constant 1 : i32
    %c0_i32_13 = arith.constant 0 : i32
    %24 = arith.cmpi eq, %arg0, %c0_i32_13 : i32
    %25 = arith.extui %24 : i1 to i32
    %c0_i32_14 = arith.constant 0 : i32
    %26 = arith.cmpi ne, %25, %c0_i32_14 : i32
    scf.if %26 {
      %c0_15 = arith.constant 0 : index
      %c0_16 = arith.constant 0 : index
      %27 = vector.load %arg6[%c0_15, %c0_16] : memref<8x128xf32, #tpu.memory_space<vmem>>, vector<8x128xf32>
      %c0_17 = arith.constant 0 : index
      %c0_18 = arith.constant 0 : index
      %28 = vector.load %arg4[%c0_17, %c0_18] : memref<8x128xf32, #tpu.memory_space<vmem>>, vector<8x128xf32>
      tpu.vector_store %arg4[%c0_17, %c0_18], %27 {strides = array<i32>} : memref<8x128xf32, #tpu.memory_space<vmem>>, vector<8x128xf32>,
      %c0_19 = arith.constant 0 : index
      %c0_20 = arith.constant 0 : index
      %29 = vector.load %arg7[%c0_19, %c0_20] : memref<8x128xf32, #tpu.memory_space<vmem>>, vector<8x128xf32>
      %c0_21 = arith.constant 0 : index
      %c0_22 = arith.constant 0 : index
      %30 = vector.load %arg5[%c0_21, %c0_22] : memref<8x128xf32, #tpu.memory_space<vmem>>, vector<8x128xf32>
      tpu.vector_store %arg5[%c0_21, %c0_22], %29 {strides = array<i32>} : memref<8x128xf32, #tpu.memory_space<vmem>>, vector<8x128xf32>,
    } else {
    }
    return
  }
  func.func @transform_0(%arg0: i32) -> (i32, i32) {
    %c0_i32 = arith.constant 0 : i32
    %c0_i32_0 = arith.constant 0 : i32
    return %arg0, %c0_i32 : i32, i32
  }
  func.func @transform_1(%arg0: i32) -> (i32, i32) {
    %c0_i32 = arith.constant 0 : i32
    %c0_i32_0 = arith.constant 0 : i32
    return %arg0, %c0_i32 : i32, i32
  }
  func.func @transform_2(%arg0: i32) -> (i32, i32) {
    %c0_i32 = arith.constant 0 : i32
    %c0_i32_0 = arith.constant 0 : i32
    return %arg0, %c0_i32 : i32, i32
  }
  func.func @transform_3(%arg0: i32) -> (i32, i32) {
    %c0_i32 = arith.constant 0 : i32
    %c0_i32_0 = arith.constant 0 : i32
    %c0_i32_1 = arith.constant 0 : i32
    return %c0_i32, %c0_i32_0 : i32, i32
  }
  func.func @transform_4(%arg0: i32) -> (i32, i32) {
    %c0_i32 = arith.constant 0 : i32
    %c0_i32_0 = arith.constant 0 : i32
    %c0_i32_1 = arith.constant 0 : i32
    return %c0_i32, %c0_i32_0 : i32, i32
  }
}

</mosaic_0001>

<bundles_post_ra>
// kernel: tpu_custom_call.1
= control target key start
LH: loop header
LB: loop body
LE: loop exit
PB: predicated region body
PF: predicated region fallthrough
CT: control target
= control target key end

     0   :  { %10 = vsyncpa [#allocation5], 0  ;;  %s355_s0 = inlined_call_operand.hbm [shape: f32[16,128], index: 0, kind: input, shape index: {}]   ;;  %s356_s1 = inlined_call_operand.hbm [shape: f32[16,128], index: 1, kind: input, shape index: {}]   ;;  %s357_s2 = inlined_call_operand.hbm [shape: f32[16,128], index: 2, kind: input, shape index: {}]   ;;  %s358_s3 = inlined_call_operand.hbm [shape: f32[8,128], index: 3, kind: output, shape index: {0}]   ;;  %s359_s4 = inlined_call_operand.hbm [shape: f32[8,128], index: 4, kind: output, shape index: {1}]  }
   0x1   :  { %11 = vsyncpa [#allocation8], 0 }
   0x2   :  { %12 = vsyncpa [#allocation6], 0 }
   0x3   :  { %13 = vsyncpa [#allocation12], 0  ;;  %s247_s15 = smov [#allocation7]   ;;  %s248_s17 = smov [#allocation4]  }
   0x4   :  { %s31_s16 = sshll.u32 %s247_s15, 4  ;;  %s19_s18 = sshll.u32 %s248_s17, 4  ;;  %s32_s16 = int_to_ptr.vmem [resolvable:$true] %s31_s16  ;;  %s279_s18 = int_to_ptr.vmem [resolvable:$true] %s19_s18 }
   0x5   :  { %s129_s21 = scalar_lea.hbm %s356_s1, 256 }
   0x6   :  { %p130_p0 = scmp.ne.s32.totalorder %s356_s1, %s129_s21  ;;  %p133_p1 = scmp.lt.u32.totalorder %s129_s21, %s356_s1 }
   0x8   :  { %p135_p2 = pnand %p133_p1, %p130_p0 }
   0xa   :  { %138 = shalt.err (!%p135_p2)
}
   0xb   :  { %s139_s26 = scalar_lea.vmem %s32_s16, 256  ;;  %p144_p4 = scmp.lt.s32.totalorder %s32_s16, %s32_s16 }
   0xc   :  { %p140_p3 = scmp.ne.s32.totalorder %s32_s16, %s139_s26  ;;  %p145_p5 = scmp.lt.s32.totalorder %s139_s26, %s139_s26 }
   0xe   :  { %p146_p6 = por %p145_p5, %p144_p4 }
  0x10   :  { %p147_p7 = pnand %p146_p6, %p140_p3 }
  0x12   :  { %150 = shalt.err (!%p147_p7)
}
  0x13   :  { %s249_s27 = smov 128   ;;  %s250_s28 = smov 8  }
  0x14   :  { %37 = dma.hbm_to_vmem [thread:$0]  %s356_s1, 256, %s32_s16, [#allocation8], %s249_s27, %s249_s27, %s250_s28  }
  0x15   :  { %s151_s7 = scalar_lea.hbm %s355_s0, 256 }
  0x16   :  { %p152_p8 = scmp.ne.s32.totalorder %s355_s0, %s151_s7  ;;  %p155_p9 = scmp.lt.u32.totalorder %s151_s7, %s355_s0 }
  0x18   :  { %p157_p10 = pnand %p155_p9, %p152_p8 }
  0x1a   :  { %160 = shalt.err (!%p157_p10)
}
  0x1b   :  { %s161_s12 = scalar_lea.vmem %s279_s18, 256  ;;  %p166_p12 = scmp.lt.s32.totalorder %s279_s18, %s279_s18 }
  0x1c   :  { %p162_p11 = scmp.ne.s32.totalorder %s279_s18, %s161_s12  ;;  %p167_p13 = scmp.lt.s32.totalorder %s161_s12, %s161_s12 }
  0x1e   :  { %p168_p0 = por %p167_p13, %p166_p12 }
  0x20   :  { %p169_p1 = pnand %p168_p0, %p162_p11 }
  0x22   :  { %172 = shalt.err (!%p169_p1)
}
  0x23   :  { %25 = dma.hbm_to_vmem [thread:$0]  %s355_s0, 256, %s279_s18, [#allocation5], %s249_s27, %s249_s27, %s250_s28  }
  0x24   :  { %s251_s14 = smov [#allocation9]   ;;  %s173_s19 = scalar_lea.hbm %s357_s2, 256 }
  0x25   :  { %s43_s15 = sshll.u32 %s251_s14, 4  ;;  %p174_p2 = scmp.ne.s32.totalorder %s357_s2, %s173_s19  ;;  %s44_s15 = int_to_ptr.vmem [resolvable:$true] %s43_s15 }
  0x26   :  { %p177_p3 = scmp.lt.u32.totalorder %s173_s19, %s357_s2 }
  0x28   :  { %p179_p4 = pnand %p177_p3, %p174_p2 }
  0x2a   :  { %182 = shalt.err (!%p179_p4)
}
  0x2b   :  { %s183_s24 = scalar_lea.vmem %s44_s15, 256  ;;  %p188_p6 = scmp.lt.s32.totalorder %s44_s15, %s44_s15 }
  0x2c   :  { %p184_p5 = scmp.ne.s32.totalorder %s44_s15, %s183_s24  ;;  %p189_p7 = scmp.lt.s32.totalorder %s183_s24, %s183_s24 }
  0x2e   :  { %p190_p8 = por %p189_p7, %p188_p6 }
  0x30   :  { %p191_p9 = pnand %p190_p8, %p184_p5 }
  0x32   :  { %194 = shalt.err (!%p191_p9)
}
  0x33   :  { %49 = dma.hbm_to_vmem [thread:$0]  %s357_s2, 256, %s44_s15, [#allocation8], %s249_s27, %s249_s27, %s250_s28  }
  0x34   :  { %239 = dma.done.wait [#allocation5], 256  }
  0x35   :  { %240 = vsyncadd [#allocation5], 4294967040 }
  0x36   :  { %241 = dma.done.wait [#allocation8], 512  }
  0x37   :  { %242 = vsyncadd [#allocation8], 4294966784  ;;  %s252_s25 = smov [#allocation11]   ;;  %v65_v0 = vld [vmem:[#allocation4] sm:$0xff]  ;;  %v66_v1 = vld [vmem:[#allocation4 + $0x8] sm:$0xff]  ;;  %s253_s2 = smov [#allocation10]  }
  0x38   :  { %s108_s26 = sshll.u32 %s252_s25, 4  ;;  %v67_v2 = vld [vmem:[#allocation7] sm:$0xff]  ;;  %v68_v3 = vld [vmem:[#allocation7 + $0x8] sm:$0xff]  ;;  %v73_v5 = vld [vmem:[#allocation9] sm:$0xff]  ;;  %s98_s27 = sshll.u32 %s253_s2, 4  ;;  %s109_s26 = int_to_ptr.vmem [resolvable:$true] %s108_s26  ;;  %s99_s27 = int_to_ptr.vmem [resolvable:$true] %s98_s27 }
  0x39   :  { %v69_v4 = vsub.f32 %v65_v0, %v67_v2  ;;  %v74_v6 = vld [vmem:[#allocation9 + $0x8] sm:$0xff]  ;;  %v70_v7 = vsub.f32 %v66_v1, %v68_v3  ;;  %s195_s28 = scalar_lea.vmem %s109_s26, 128  ;;  %p200_p11 = scmp.lt.s32.totalorder %s109_s26, %s109_s26 }
  0x3a   :  { %v82_v8 = vadd.f32 %v74_v6, %v73_v5  ;;  %p196_p10 = scmp.ne.s32.totalorder %s109_s26, %s195_s28  ;;  %p201_p12 = scmp.lt.s32.totalorder %s195_s28, %s195_s28 }
  0x3b   :  { %v71_v9 = vand.u32 2147483647, %v69_v4  ;;  %v72_v10 = vand.u32 2147483647, %v70_v7 }
  0x3c   :  { %91 = vst [vmem:[#allocation11] sm:$0xff] %v82_v8  ;;  %p202_p13 = por %p201_p12, %p200_p11 }
  0x3d   :  { %v75_v11 = vmul.f32 %v73_v5, %v71_v9 }
  0x3e   :  { %p203_p0 = pnand %p202_p13, %p196_p10 }
  0x40   :  { %206 = shalt.err (!%p203_p0)
}
  0x41   :  { %s207_s5 = scalar_lea.hbm %s359_s4, 128 }
  0x42   :  { %p208_p1 = scmp.ne.s32.totalorder %s359_s4, %s207_s5  ;;  %p211_p2 = scmp.lt.u32.totalorder %s207_s5, %s359_s4 }
  0x44   :  { %p213_p3 = pnand %p211_p2, %p208_p1 }
  0x46   :  { %216 = shalt.err (!%p213_p3)
}
  0x47   :  { %111 = dma.vmem_to_hbm [thread:$0]  %s109_s26, 128, %s359_s4, [#allocation12]   ;;  %v76_v12 = vmul.f32 %v74_v6, %v72_v10 }
  0x48   :  { %s217_s12 = scalar_lea.vmem %s99_s27, 128  ;;  %p222_p5 = scmp.lt.s32.totalorder %s99_s27, %s99_s27 }
  0x49   :  { %v78_v13 = vadd.f32 %v76_v12, %v75_v11  ;;  %p218_p4 = scmp.ne.s32.totalorder %s99_s27, %s217_s12  ;;  %p223_p6 = scmp.lt.s32.totalorder %s217_s12, %s217_s12 }
  0x4b   :  { %89 = vst [vmem:[#allocation10] sm:$0xff] %v78_v13  ;;  %p224_p7 = por %p223_p6, %p222_p5 }
  0x4d   :  { %p225_p8 = pnand %p224_p7, %p218_p4 }
  0x4f   :  { %228 = shalt.err (!%p225_p8)
}
  0x50   :  { %s229_s14 = scalar_lea.hbm %s358_s3, 128 }
  0x51   :  { %p230_p9 = scmp.ne.s32.totalorder %s358_s3, %s229_s14  ;;  %p233_p10 = scmp.lt.u32.totalorder %s229_s14, %s358_s3 }
  0x53   :  { %p235_p11 = pnand %p233_p10, %p230_p9 }
  0x55   :  { %238 = shalt.err (!%p235_p11)
}
  0x56   :  { %101 = dma.vmem_to_hbm [thread:$0]  %s99_s27, 128, %s358_s3, [#allocation6]  }
  0x57   :  { %243 = dma.done.wait [#allocation6], 128  }
  0x58   :  { %244 = vsyncadd [#allocation6], 4294967168 }
  0x59   :  { %245 = dma.done.wait [#allocation12], 128  }
  0x5a   :  { %246 = vsyncadd [#allocation12], 4294967168 }
  0x5b   :  { %118 = vsyncpa [#allocation5], 1 }
  0x5c   :  { %119 = vsyncpa [#allocation8], 1 }
  0x5d   :  { %120 = vsyncpa [#allocation6], 1 }
  0x5e   :  { %121 = vsyncpa [#allocation12], 1 }

</bundles_post_ra>
